<compile_context>
chip_gen: v5e
topology: v5e:2x2
jax: 0.10.0
libtpu: 0.0.40
codegen_flags: <defaults>
</compile_context>

<pallas_src>
import jax
import jax.numpy as jnp
from jax.experimental import pallas as pl
from jax.experimental.pallas import tpu as pltpu

LANE = 128     # lane width (last dim)
SUBLANE = 8    # f32 sublane width (second-to-last dim)


def _round_up(n, m):
    return ((n + m - 1) // m) * m


# ----------------------------------------------------------------------------
# Fused whole-tree kernel:  act = x;  for each packed layer: act = relu(act@W+b)
# One grid-less invocation with full-array VMEM blocks; the whole layer chain
# runs on-chip and only x / stacked params / packed output touch HBM.
# ----------------------------------------------------------------------------
def _make_tree_kernel(n_layers):
    def kernel(x_ref, w_ref, b_ref, o_ref):
        act = x_ref[...]                                    # (B_pad, D_pad) f32
        for j in range(n_layers):                           # static, fully unrolled
            w = w_ref[j]                                    # (D_pad, D_pad) bf16
            b = b_ref[j]                                    # (1, D_pad) f32
            acc = jnp.dot(act.astype(jnp.bfloat16), w,
                          preferred_element_type=jnp.float32)
            act = jnp.maximum(acc + b, 0.0)
        # NOTE: padded batch rows carry relu(bias) garbage; they are sliced off
        # outside and the kernel never reduces over batch, so this is exact.
        o_ref[...] = act
    return kernel


def fused_tree_call(x_pad, w_stack, b_stack):
    n_layers, d_pad, _ = w_stack.shape
    b_pad = x_pad.shape[0]
    flops = 2 * n_layers * b_pad * d_pad * d_pad
    bytes_accessed = (x_pad.size * 4            # x (f32)
                      + w_stack.size * 2        # stacked weights (bf16)
                      + b_stack.size * 4        # stacked biases (f32)
                      + b_pad * d_pad * 4)      # packed output (f32)
    return pl.pallas_call(
        _make_tree_kernel(n_layers),
        out_shape=jax.ShapeDtypeStruct((b_pad, d_pad), jnp.float32),
        in_specs=[pl.BlockSpec(memory_space=pltpu.MemorySpace.VMEM)] * 3,
        out_specs=pl.BlockSpec(memory_space=pltpu.MemorySpace.VMEM),
        cost_estimate=pl.CostEstimate(
            flops=flops, transcendentals=0, bytes_accessed=bytes_accessed),
    )(x_pad, w_stack, b_stack)


# ----------------------------------------------------------------------------
# Deterministic parameter construction (mirrors the Root/RootLevel/Pipe tree)
# ----------------------------------------------------------------------------
def _make_linear(key, din, dout):
    kw, kb = jax.random.split(key)
    bound = 1.0 / (din ** 0.5)
    w = jax.random.uniform(kw, (din, dout), jnp.float32, -bound, bound)  # [in,out]
    b = jax.random.uniform(kb, (dout,), jnp.float32, -bound, bound)
    return w, b


def build_levels(key, emed_dim, forks, depth, out_dim):
    """Per-node per-layer params, organised level-by-level (nodes in DFS order)."""
    spl = depth // len(forks)
    size_step = max(1, int((emed_dim - out_dim) / depth))
    sizes = list(range(emed_dim, out_dim, -size_step))
    sizes = sizes[0:depth] + [out_dim]
    short = depth - len(sizes)
    if short > 0:
        sizes = sizes + [out_dim] * short

    levels = []
    n_nodes = 1
    remaining = sizes
    lvl_keys = jax.random.split(key, len(forks))
    for lvl_idx, f in enumerate(forks):
        n_nodes *= f
        last = lvl_idx == len(forks) - 1
        pipe_sizes = list(remaining) if last else list(remaining[:spl])
        # TODO(synk): degenerate identity pipes (len < 2) are not supported.
        assert len(pipe_sizes) >= 2, "degenerate (identity) pipe not supported"
        node_keys = jax.random.split(lvl_keys[lvl_idx], n_nodes)
        node_params = []
        for i in range(n_nodes):
            layer_keys = jax.random.split(node_keys[i], len(pipe_sizes) - 1)
            node_params.append([
                _make_linear(layer_keys[j], pipe_sizes[j], pipe_sizes[j + 1])
                for j in range(len(pipe_sizes) - 1)])
        levels.append(dict(n_nodes=n_nodes, sizes=pipe_sizes,
                           node_params=node_params))
        remaining = remaining[spl - 1:]
    return levels, sizes


def pack_levels(levels, emed_dim):
    """Pack all sibling pipes of each level into block-structured weights,
    zero-padded to one common lane-aligned width D_pad, and stack all layers:
      returns (W_stack [L, D_pad, D_pad] bf16, B_stack [L, 1, D_pad] f32, D_pad).
    """
    layers = []          # (blocks, in_total, out_total) in execution order
    parent_count = 1
    for lvl in levels:
        n = lvl["n_nodes"]
        ds = lvl["sizes"]
        fanout = n // parent_count
        for j in range(len(ds) - 1):
            dj, dj1 = ds[j], ds[j + 1]
            in_total = parent_count * dj if j == 0 else n * dj
            out_total = n * dj1
            blocks = []
            for i in range(n):
                w, b = lvl["node_params"][i][j]
                r0 = (i // fanout) * dj if j == 0 else i * dj
                c0 = i * dj1
                blocks.append((r0, c0, w, b))
            layers.append((blocks, in_total, out_total))
        parent_count = n

    # Activation widths must chain exactly layer-to-layer (keeps the packing honest).
    prev_out = emed_dim
    for _, in_total, out_total in layers:
        assert in_total == prev_out, "activation packing mismatch"
        prev_out = out_total

    d_pad = _round_up(max([emed_dim] + [max(it, ot) for _, it, ot in layers]), LANE)

    n_layers = len(layers)
    w_stack = jnp.zeros((n_layers, d_pad, d_pad), jnp.float32)
    b_stack = jnp.zeros((n_layers, 1, d_pad), jnp.float32)
    for l, (blocks, _, _) in enumerate(layers):
        for r0, c0, w, b in blocks:
            di, do = w.shape
            w_stack = w_stack.at[l, r0:r0 + di, c0:c0 + do].set(w)
            b_stack = b_stack.at[l, 0, c0:c0 + do].set(b)
    return w_stack.astype(jnp.bfloat16), b_stack, d_pad


# ----------------------------------------------------------------------------
# Forward passes
# ----------------------------------------------------------------------------
def make_root_forward(emed_dim, out_dim, n_leaves, d_pad):
    @jax.jit
    def fwd(w_stack, b_stack, x):
        bsz = x.shape[0]
        b_pad = _round_up(max(bsz, 1), SUBLANE)
        x_pad = jnp.zeros((b_pad, d_pad), jnp.float32).at[:bsz, :emed_dim].set(x)
        y = fused_tree_call(x_pad, w_stack, b_stack)
        # Leaves are packed along the lane dim in DFS order (same order as the
        # PyTorch module's output list); return one packed array instead of
        # n_leaves tiny non-lane-aligned slices.
        return y[:bsz, :n_leaves * out_dim].reshape(bsz, n_leaves, out_dim)
    return fwd


def to_output_list(y3):
    """API parity with the PyTorch module: list of [batch, out_dim] tensors."""
    return [y3[:, i, :] for i in range(y3.shape[1])]


def reference_forward(levels, x):
    """Pure-JAX unfused reference, mirroring the original module exactly."""
    prev_acts = [x]
    for lvl in levels:
        fanout = lvl["n_nodes"] // len(prev_acts)
        acts = []
        for i in range(lvl["n_nodes"]):
            a = prev_acts[i // fanout]
            for w, b in lvl["node_params"][i]:
                a = jnp.maximum(a @ w + b, 0.0)
            acts.append(a)
        prev_acts = acts
    return prev_acts


if __name__ == "__main__":
    # Root(emed_dim=32, forks=[2, 2], depth=4, out_dim=8)
    #  -> sizes = [32, 26, 20, 14, 8], sizes_pr_level = 2
    #  -> 2 top-level nodes (Lin 32->26 + ReLU), each with 2 leaf nodes
    #     (Lin 26->20, 20->14, 14->8, each + ReLU) -> 4 outputs of [batch, 8].
    emed_dim, forks, depth, out_dim = 32, [2, 2], 4, 8
    batch = 2

    key = jax.random.PRNGKey(0)
    k_params, k_x = jax.random.split(key)

    levels, _sizes = build_levels(k_params, emed_dim, forks, depth, out_dim)
    w_stack, b_stack, d_pad = pack_levels(levels, emed_dim)

    n_leaves = levels[-1]["n_nodes"]
    root_forward = make_root_forward(emed_dim, out_dim, n_leaves, d_pad)

    x = jax.random.normal(k_x, (batch, emed_dim), jnp.float32)

    y3 = root_forward(w_stack, b_stack, x)           # (batch, n_leaves, out_dim)
    y3 = jax.block_until_ready(y3)
    outs = to_output_list(y3)                        # DFS-ordered list, like PyTorch

    # Sanity check against the unfused pure-JAX reference of the original tree.
    # Kernel uses bf16 operands / f32 accumulation (TPU-native matmul), hence
    # the bf16-level tolerance.
    refs = reference_forward(levels, x)
    assert len(outs) == n_leaves == 4
    assert y3.shape == (batch, n_leaves, out_dim)
    for o, r in zip(outs, refs):
        assert o.shape == (batch, out_dim)
        assert jnp.allclose(o, r, rtol=2e-2, atol=2e-2), "mismatch vs reference"

    print("KERNEL_OK")
</pallas_src>

<mosaic_0001>
module attributes {stable_mosaic.version = 11 : i64} {
  func.func @kernel(%arg0: memref<8x128xf32, #tpu.memory_space<vmem>>, %arg1: memref<4x128x128xbf16, #tpu.memory_space<vmem>>, %arg2: memref<4x1x128xf32, #tpu.memory_space<vmem>>, %arg3: memref<8x128xf32, #tpu.memory_space<vmem>>) attributes {dimension_semantics = [], scalar_prefetch = 0 : i64, scratch_operands = 0 : i64, tpu.core_type = #tpu.core_type<tc>} {
    %c0 = arith.constant 0 : index
    %c0_0 = arith.constant 0 : index
    %0 = vector.load %arg0[%c0, %c0_0] : memref<8x128xf32, #tpu.memory_space<vmem>>, vector<8x128xf32>
    %c0_1 = arith.constant 0 : index
    %c0_2 = arith.constant 0 : index
    %c0_3 = arith.constant 0 : index
    %1 = vector.load %arg1[%c0_1, %c0_2, %c0_3] : memref<4x128x128xbf16, #tpu.memory_space<vmem>>, vector<1x128x128xbf16>
    %2 = vector.shape_cast %1 : vector<1x128x128xbf16> to vector<128x128xbf16>
    %c0_4 = arith.constant 0 : index
    %c0_5 = arith.constant 0 : index
    %c0_6 = arith.constant 0 : index
    %3 = vector.load %arg2[%c0_4, %c0_5, %c0_6] : memref<4x1x128xf32, #tpu.memory_space<vmem>>, vector<1x1x128xf32>
    %4 = vector.shape_cast %3 : vector<1x1x128xf32> to vector<1x128xf32>
    %5 = arith.truncf %0 : vector<8x128xf32> to vector<8x128xbf16>
    %cst = arith.constant dense<0.000000e+00> : vector<8x128xf32>
    %6 = tpu.matmul %5, %2, %cst {dimension_numbers = #tpu.dot_dimension_numbers<[1], [0], [0], [1], [0, 0, 1, 1], [], []>} : vector<8x128xbf16>, vector<128x128xbf16>, vector<8x128xf32> -> vector<8x128xf32>
    %7 = vector.broadcast %4 : vector<1x128xf32> to vector<8x128xf32>
    %8 = arith.addf %6, %7 : vector<8x128xf32>
    %cst_7 = arith.constant 0.000000e+00 : f32
    %9 = vector.broadcast %cst_7 : f32 to vector<8x128xf32>
    %10 = arith.maximumf %8, %9 : vector<8x128xf32>
    %c1 = arith.constant 1 : index
    %c0_8 = arith.constant 0 : index
    %c0_9 = arith.constant 0 : index
    %11 = vector.load %arg1[%c1, %c0_8, %c0_9] : memref<4x128x128xbf16, #tpu.memory_space<vmem>>, vector<1x128x128xbf16>
    %12 = vector.shape_cast %11 : vector<1x128x128xbf16> to vector<128x128xbf16>
    %c1_10 = arith.constant 1 : index
    %c0_11 = arith.constant 0 : index
    %c0_12 = arith.constant 0 : index
    %13 = vector.load %arg2[%c1_10, %c0_11, %c0_12] : memref<4x1x128xf32, #tpu.memory_space<vmem>>, vector<1x1x128xf32>
    %14 = vector.shape_cast %13 : vector<1x1x128xf32> to vector<1x128xf32>
    %15 = arith.truncf %10 : vector<8x128xf32> to vector<8x128xbf16>
    %cst_13 = arith.constant dense<0.000000e+00> : vector<8x128xf32>
    %16 = tpu.matmul %15, %12, %cst_13 {dimension_numbers = #tpu.dot_dimension_numbers<[1], [0], [0], [1], [0, 0, 1, 1], [], []>} : vector<8x128xbf16>, vector<128x128xbf16>, vector<8x128xf32> -> vector<8x128xf32>
    %17 = vector.broadcast %14 : vector<1x128xf32> to vector<8x128xf32>
    %18 = arith.addf %16, %17 : vector<8x128xf32>
    %cst_14 = arith.constant 0.000000e+00 : f32
    %19 = vector.broadcast %cst_14 : f32 to vector<8x128xf32>
    %20 = arith.maximumf %18, %19 : vector<8x128xf32>
    %c2 = arith.constant 2 : index
    %c0_15 = arith.constant 0 : index
    %c0_16 = arith.constant 0 : index
    %21 = vector.load %arg1[%c2, %c0_15, %c0_16] : memref<4x128x128xbf16, #tpu.memory_space<vmem>>, vector<1x128x128xbf16>
    %22 = vector.shape_cast %21 : vector<1x128x128xbf16> to vector<128x128xbf16>
    %c2_17 = arith.constant 2 : index
    %c0_18 = arith.constant 0 : index
    %c0_19 = arith.constant 0 : index
    %23 = vector.load %arg2[%c2_17, %c0_18, %c0_19] : memref<4x1x128xf32, #tpu.memory_space<vmem>>, vector<1x1x128xf32>
    %24 = vector.shape_cast %23 : vector<1x1x128xf32> to vector<1x128xf32>
    %25 = arith.truncf %20 : vector<8x128xf32> to vector<8x128xbf16>
    %cst_20 = arith.constant dense<0.000000e+00> : vector<8x128xf32>
    %26 = tpu.matmul %25, %22, %cst_20 {dimension_numbers = #tpu.dot_dimension_numbers<[1], [0], [0], [1], [0, 0, 1, 1], [], []>} : vector<8x128xbf16>, vector<128x128xbf16>, vector<8x128xf32> -> vector<8x128xf32>
    %27 = vector.broadcast %24 : vector<1x128xf32> to vector<8x128xf32>
    %28 = arith.addf %26, %27 : vector<8x128xf32>
    %cst_21 = arith.constant 0.000000e+00 : f32
    %29 = vector.broadcast %cst_21 : f32 to vector<8x128xf32>
    %30 = arith.maximumf %28, %29 : vector<8x128xf32>
    %c3 = arith.constant 3 : index
    %c0_22 = arith.constant 0 : index
    %c0_23 = arith.constant 0 : index
    %31 = vector.load %arg1[%c3, %c0_22, %c0_23] : memref<4x128x128xbf16, #tpu.memory_space<vmem>>, vector<1x128x128xbf16>
    %32 = vector.shape_cast %31 : vector<1x128x128xbf16> to vector<128x128xbf16>
    %c3_24 = arith.constant 3 : index
    %c0_25 = arith.constant 0 : index
    %c0_26 = arith.constant 0 : index
    %33 = vector.load %arg2[%c3_24, %c0_25, %c0_26] : memref<4x1x128xf32, #tpu.memory_space<vmem>>, vector<1x1x128xf32>
    %34 = vector.shape_cast %33 : vector<1x1x128xf32> to vector<1x128xf32>
    %35 = arith.truncf %30 : vector<8x128xf32> to vector<8x128xbf16>
    %cst_27 = arith.constant dense<0.000000e+00> : vector<8x128xf32>
    %36 = tpu.matmul %35, %32, %cst_27 {dimension_numbers = #tpu.dot_dimension_numbers<[1], [0], [0], [1], [0, 0, 1, 1], [], []>} : vector<8x128xbf16>, vector<128x128xbf16>, vector<8x128xf32> -> vector<8x128xf32>
    %37 = vector.broadcast %34 : vector<1x128xf32> to vector<8x128xf32>
    %38 = arith.addf %36, %37 : vector<8x128xf32>
    %cst_28 = arith.constant 0.000000e+00 : f32
    %39 = vector.broadcast %cst_28 : f32 to vector<8x128xf32>
    %40 = arith.maximumf %38, %39 : vector<8x128xf32>
    %c0_29 = arith.constant 0 : index
    %c0_30 = arith.constant 0 : index
    %41 = vector.load %arg3[%c0_29, %c0_30] : memref<8x128xf32, #tpu.memory_space<vmem>>, vector<8x128xf32>
    tpu.vector_store %arg3[%c0_29, %c0_30], %40 {strides = array<i32>} : memref<8x128xf32, #tpu.memory_space<vmem>>, vector<8x128xf32>,
    return
  }
}

</mosaic_0001>

<bundles_post_ra>
// kernel: fwd.1
= control target key start
LH: loop header
LB: loop body
LE: loop exit
PB: predicated region body
PF: predicated region fallthrough
CT: control target
= control target key end

     0   :  { %8 = vsyncpa [#allocation3], 0  ;;  %s571_s15 = smov [#allocation2]   ;;  %s572_s17 = smov 64   ;;  %s615_s0 = inlined_call_operand.vmem [shape: f32[8,128], index: 0, kind: input, shape index: {}]   ;;  %s616_s1 = inlined_call_operand.hbm [shape: bf16[4,128,128], index: 1, kind: input, shape index: {}]   ;;  %s617_s2 = inlined_call_operand.vmem [shape: f32[4,1,128], index: 2, kind: input, shape index: {}]   ;;  %s618_s3 = inlined_call_operand.vmem [shape: f32[8,128], index: 3, kind: output, shape index: {}]  }
   0x1   :  { %s15_s14 = sshll.u32 %s616_s1, 4  ;;  %s17_s16 = sshll.u32 %s571_s15, 4  ;;  %s16_s14 = int_to_ptr.hbm [resolvable:$true] %s15_s14  ;;  %s18_s16 = int_to_ptr.vmem [resolvable:$true] %s17_s16 }
   0x2   :  { %s573_s18 = smov 4  }
   0x3   :  { %23 = dma.hbm_to_vmem [thread:$0]  %s16_s14, 4096, %s18_s16, [#allocation3], %s572_s17, %s572_s17, %s573_s18  }
   0x4   :  { %569 = dma.done.wait [#allocation3], 4096  }
   0x5   :  { %570 = vsyncadd [#allocation3], 4294963200  ;;  %v513_v0 = vld [vmem:[#allocation2 + $0x38] sm:$0xff]  ;;  %v512_v1 = vld [vmem:[#allocation2 + $0x30] sm:$0xff] }
   0x6   :  { %100 = vmatpush.bf16.msra.mxu0 %v513_v0  ;;  %v521_v2 = vld [vmem:[#allocation2 + $0x78] sm:$0xff]  ;;  %v520_v3 = vld [vmem:[#allocation2 + $0x70] sm:$0xff]  ;;  %v511_v4 = vld [vmem:[#allocation2 + $0x28] sm:$0xff] }
   0x7   :  { %185 = vmatpush.bf16.msra.mxu1 %v521_v2  ;;  %v519_v5 = vld [vmem:[#allocation2 + $0x68] sm:$0xff]  ;;  %v510_v6 = vld [vmem:[#allocation2 + $0x20] sm:$0xff]  ;;  %v509_v8 = vld [vmem:[#allocation2 + $0x18] sm:$0xff] }
   0x8   :  { %v518_v7 = vld [vmem:[#allocation2 + $0x60] sm:$0xff]  ;;  %v517_v9 = vld [vmem:[#allocation2 + $0x58] sm:$0xff]  ;;  %v508_v10 = vld [vmem:[#allocation2 + $0x10] sm:$0xff] }
   0x9   :  { %v516_v11 = vld [vmem:[#allocation2 + $0x50] sm:$0xff]  ;;  %v507_v12 = vld [vmem:[#allocation2 + $0x8] sm:$0xff]  ;;  %v506_v13 = vld [vmem:[#allocation2] sm:$0xff] }
   0xa   :  { %101 = vmatpush.bf16.msra.mxu0 %v512_v1  ;;  %v30_v14 = vld [vmem:[%s615_s0] sm:$0xff]  ;;  %v515_v16 = vld [vmem:[#allocation2 + $0x48] sm:$0xff]  ;;  %v529_v18 = vld [vmem:[#allocation2 + $0xb8] sm:$0xff] }
   0xb   :  { %186 = vmatpush.bf16.msra.mxu1 %v520_v3  ;;  %v48_v15 = vpack.c.bf16 %v30_v14, %v30_v14  ;;  %v514_v17 = vld [vmem:[#allocation2 + $0x40] sm:$0xff]  ;;  %270 = vmatpush.bf16.msra.mxu2 %v529_v18  ;;  %v528_v19 = vld [vmem:[#allocation2 + $0xb0] sm:$0xff]  ;;  %v527_v20 = vld [vmem:[#allocation2 + $0xa8] sm:$0xff] }
   0xc   :  { %v526_v21 = vld [vmem:[#allocation2 + $0xa0] sm:$0xff]  ;;  %v525_v22 = vld [vmem:[#allocation2 + $0x98] sm:$0xff]  ;;  %v524_v23 = vld [vmem:[#allocation2 + $0x90] sm:$0xff] }
   0xd   :  { %v541_v24 = vld [vmem:[%s617_s2] ss:$0 sm:$0xff]  ;;  %v523_v30 = vld [vmem:[#allocation2 + $0x88] sm:$0xff]  ;;  %v537_v32 = vld [vmem:[#allocation2 + $0xf8] sm:$0xff] }
   0xe   :  { %102 = vmatpush.bf16.msra.mxu0 %v511_v4  ;;  %v522_v31 = vld [vmem:[#allocation2 + $0x80] sm:$0xff]  ;;  %355 = vmatpush.bf16.msra.mxu3 %v537_v32  ;;  %v536_v33 = vld [vmem:[#allocation2 + $0xf0] sm:$0xff]  ;;  %v535_v34 = vld [vmem:[#allocation2 + $0xe8] sm:$0xff] }
   0xf   :  { %187 = vmatpush.bf16.msra.mxu1 %v519_v5  ;;  %271 = vmatpush.bf16.msra.mxu2 %v528_v19  ;;  %v534_v35 = vld [vmem:[#allocation2 + $0xe0] sm:$0xff]  ;;  %v533_v36 = vld [vmem:[#allocation2 + $0xd8] sm:$0xff]  ;;  %v532_v37 = vld [vmem:[#allocation2 + $0xd0] sm:$0xff] }
  0x10   :  { %v542_v38 = vld [vmem:[%s617_s2 + $0x1] ss:$0 sm:$0xff]  ;;  %v531_v44 = vld [vmem:[#allocation2 + $0xc8] sm:$0xff]  ;;  %v543_v46 = vld [vmem:[%s617_s2 + $0x2] ss:$0 sm:$0xff] }
  0x11   :  { %v530_v45 = vld [vmem:[#allocation2 + $0xc0] sm:$0xff] }
  0x12   :  { %103 = vmatpush.bf16.msra.mxu0 %v510_v6  ;;  %356 = vmatpush.bf16.msra.mxu3 %v536_v33  ;;  %v544_v52 = vld [vmem:[%s617_s2 + $0x3] ss:$0 sm:$0xff] }
  0x13   :  { %188 = vmatpush.bf16.msra.mxu1 %v518_v7  ;;  %272 = vmatpush.bf16.msra.mxu2 %v527_v20 }
  0x16   :  { %104 = vmatpush.bf16.msra.mxu0 %v509_v8  ;;  %357 = vmatpush.bf16.msra.mxu3 %v535_v34 }
  0x17   :  { %189 = vmatpush.bf16.msra.mxu1 %v517_v9  ;;  %273 = vmatpush.bf16.msra.mxu2 %v526_v21 }
  0x1a   :  { %105 = vmatpush.bf16.msra.mxu0 %v508_v10  ;;  %358 = vmatpush.bf16.msra.mxu3 %v534_v35 }
  0x1b   :  { %190 = vmatpush.bf16.msra.mxu1 %v516_v11  ;;  %274 = vmatpush.bf16.msra.mxu2 %v525_v22 }
  0x1e   :  { %106 = vmatpush.bf16.msra.mxu0 %v507_v12  ;;  %359 = vmatpush.bf16.msra.mxu3 %v533_v36 }
  0x1f   :  { %191 = vmatpush.bf16.msra.mxu1 %v515_v16  ;;  %275 = vmatpush.bf16.msra.mxu2 %v524_v23 }
  0x22   :  { %107 = vmatpush.bf16.msra.mxu0 %v506_v13  ;;  %360 = vmatpush.bf16.msra.mxu3 %v532_v37 }
  0x23   :  { %192 = vmatpush.bf16.msra.mxu1 %v514_v17  ;;  %276 = vmatpush.bf16.msra.mxu2 %v523_v30 }
  0x25   :  { %108 = vmatmul.bf16.vlgmr.msra.gmra.mxu0 %v48_v15 }
  0x26   :  { %361 = vmatpush.bf16.msra.mxu3 %v531_v44 }
  0x27   :  { %277 = vmatpush.bf16.msra.mxu2 %v522_v31 }
  0x2a   :  { %362 = vmatpush.bf16.msra.mxu3 %v530_v45 }
  0xa2   :  { %v109_v25 = vpop.f32.mrf.mxu0 }
  0xa3   :  { %v110_v26 = vadd.f32 %v541_v24, %v109_v25 }
  0xa5   :  { %v113_v27 = vmax.f32 %v110_v26, 0.0 }
  0xa7   :  { %v133_v28 = vpack.c.bf16 %v113_v27, %v113_v27 }
  0xa9   :  { %193 = vmatmul.bf16.vlgmr.msra.gmra.mxu1 %v133_v28 }
  0xaa   :  { %v111_v29 = vpop.f32.mrf.mxu0 }
 0x126   :  { %v194_v39 = vpop.f32.mrf.mxu1 }
 0x127   :  { %v195_v40 = vadd.f32 %v542_v38, %v194_v39 }
 0x129   :  { %v198_v41 = vmax.f32 %v195_v40, 0.0 }
 0x12b   :  { %v218_v42 = vpack.c.bf16 %v198_v41, %v198_v41 }
 0x12d   :  { %278 = vmatmul.bf16.vlgmr.msra.gmra.mxu2 %v218_v42 }
 0x12e   :  { %v196_v43 = vpop.f32.mrf.mxu1 }
 0x1b0   :  { %v279_v47 = vpop.f32.mrf.mxu2 }
 0x1b1   :  { %v280_v48 = vadd.f32 %v543_v46, %v279_v47 }
 0x1b3   :  { %v283_v49 = vmax.f32 %v280_v48, 0.0 }
 0x1b5   :  { %v303_v50 = vpack.c.bf16 %v283_v49, %v283_v49 }
 0x1b7   :  { %363 = vmatmul.bf16.vlgmr.msra.gmra.mxu3 %v303_v50 }
 0x1b8   :  { %v281_v51 = vpop.f32.mrf.mxu2 }
 0x23a   :  { %v364_v53 = vpop.f32.mrf.mxu3 }
 0x23b   :  { %v365_v54 = vadd.f32 %v544_v52, %v364_v53 }
 0x23d   :  { %v368_v55 = vmax.f32 %v365_v54, 0.0 }
 0x23f   :  { %369 = vst [vmem:[%s618_s3] sm:$0xff] %v368_v55 }
 0x242   :  { %v366_v56 = vpop.f32.mrf.mxu3 }
 0x243   :  { %374 = vsyncpa [#allocation3], 1 }

</bundles_post_ra>
